<compile_context>
chip_gen: v7x
topology: tpu7x:2x2x1
jax: 0.10.0
libtpu: 0.0.40
codegen_flags: <defaults>
</compile_context>

<pallas_src>
import jax
import jax.numpy as jnp
from jax.experimental import pallas as pl
from jax.experimental.pallas import tpu as pltpu


# ----------------------------------------------------------------------------
# Kernel
# ----------------------------------------------------------------------------
def attention_block_kernel(g_ref, x_ref,
                           wg_ref, gamg_ref, betg_ref,
                           wx_ref, gamx_ref, betx_ref,
                           wp_ref, gamp_ref, betp_ref,
                           o_ref):
    # g_ref : (F_g, P)      x_ref : (F_x, P)      P = N*H*W  (lane axis)
    # wg_ref: (F_int, F_g)  wx_ref: (F_int, F_x)  wp_ref: (1, F_int)
    # gam*/bet*: (C, 1) per-channel BN affine params
    # o_ref : (F_x, P)
    eps = 1e-5

    def bn_rows(y, gam_ref, bet_ref):
        # Training-mode BatchNorm2d: per-channel (per-row) stats over N*H*W,
        # biased variance.  Lane-axis reductions -> XLU; normalize on VPU.
        mean = jnp.mean(y, axis=1, keepdims=True)
        var = jnp.mean(jnp.square(y - mean), axis=1, keepdims=True)
        return (y - mean) * jax.lax.rsqrt(var + eps) * gam_ref[...] + bet_ref[...]

    g = g_ref[...]
    x = x_ref[...]

    # W_g / W_x 1x1 convs as single matmuls (conv bias cancelled by BN mean).
    g1 = bn_rows(jnp.dot(wg_ref[...], g, preferred_element_type=jnp.float32),
                 gamg_ref, betg_ref)
    x1 = bn_rows(jnp.dot(wx_ref[...], x, preferred_element_type=jnp.float32),
                 gamx_ref, betx_ref)

    inter = jnp.maximum(g1 + x1, 0.0)                       # (F_int, P)

    # psi: 1x1 conv to a single channel + BN (bias again cancelled by BN).
    psi = bn_rows(jnp.dot(wp_ref[...], inter, preferred_element_type=jnp.float32),
                  gamp_ref, betp_ref)                       # (1, P)

    att = 1.0 / (1.0 + jnp.exp(-psi))                       # sigmoid, (1, P)

    # Broadcast attention map over the F_x channel rows; lane-dense store.
    o_ref[...] = (att * x).astype(o_ref.dtype)


# ----------------------------------------------------------------------------
# Wrapper
# ----------------------------------------------------------------------------
def attention_block_forward(g_nchw, x_nchw, params):
    """g: (N, F_g, H, W), x: (N, F_x, H, W) float32 -> (N, F_x, H, W)."""
    (wg, bg, gam_g, bet_g,
     wx, gam_x, bet_x,
     wpsi, bpsi, gam_p, bet_p) = params

    N, Fx, H, W = x_nchw.shape
    Ng, Fg, Hg, Wg_sp = g_nchw.shape
    assert Ng == N
    # TODO(synk): if (Hg, Wg_sp) != (H, W) a bilinear upsample of g1 is needed;
    # the kernel path below assumes matching spatial sizes (upsample == id).
    assert (Hg, Wg_sp) == (H, W)

    F_int = wg.shape[0]
    P = N * H * W

    # Channels-major, lane-dense views: (C, N*H*W).
    g_cm = jnp.transpose(g_nchw, (1, 0, 2, 3)).reshape(Fg, P)
    x_cm = jnp.transpose(x_nchw, (1, 0, 2, 3)).reshape(Fx, P)

    gam_g2 = gam_g.reshape(F_int, 1)
    bet_g2 = bet_g.reshape(F_int, 1)
    gam_x2 = gam_x.reshape(F_int, 1)
    bet_x2 = bet_x.reshape(F_int, 1)
    gam_p2 = gam_p.reshape(1, 1)
    bet_p2 = bet_p.reshape(1, 1)

    def full(shape):
        return pl.BlockSpec(shape, lambda i, _s=shape: (0,) * len(_s))

    flops = 2 * P * (F_int * Fg + F_int * Fx + F_int) + 12 * P * F_int
    bytes_accessed = 4 * (Fg * P + 2 * Fx * P
                          + F_int * (Fg + Fx + 1) + 6 * F_int + 6)
    cost = pl.CostEstimate(flops=flops, transcendentals=P,
                           bytes_accessed=bytes_accessed)

    out_cm = pl.pallas_call(
        attention_block_kernel,
        out_shape=jax.ShapeDtypeStruct((Fx, P), jnp.float32),
        grid=(1,),
        in_specs=[
            full((Fg, P)),
            full((Fx, P)),
            full((F_int, Fg)), full((F_int, 1)), full((F_int, 1)),
            full((F_int, Fx)), full((F_int, 1)), full((F_int, 1)),
            full((1, F_int)), full((1, 1)), full((1, 1)),
        ],
        out_specs=full((Fx, P)),
        compiler_params=pltpu.CompilerParams(
            dimension_semantics=("arbitrary",)),
        cost_estimate=cost,
    )(g_cm, x_cm,
      wg, gam_g2, bet_g2,
      wx, gam_x2, bet_x2,
      wpsi, gam_p2, bet_p2)

    # (F_x, N*H*W) -> (N, F_x, H, W)
    return jnp.transpose(out_cm.reshape(Fx, N, H, W), (1, 0, 2, 3))


# ----------------------------------------------------------------------------
# Pure-JAX reference (keeps the conv biases; training-mode BN; bilinear
# upsample handled generally, identity at matching sizes).
# ----------------------------------------------------------------------------
def reference_forward(g, x, params):
    (wg, bg, gam_g, bet_g,
     wx, gam_x, bet_x,
     wpsi, bpsi, gam_p, bet_p) = params
    eps = 1e-5

    def conv1x1(t, w, b=None):
        y = jnp.einsum('oc,nchw->nohw', w, t)
        if b is not None:
            y = y + b.reshape(1, -1, 1, 1)
        return y

    def bn(y, gam, bet):
        mean = jnp.mean(y, axis=(0, 2, 3), keepdims=True)
        var = jnp.mean((y - mean) ** 2, axis=(0, 2, 3), keepdims=True)
        return ((y - mean) * jax.lax.rsqrt(var + eps)
                * gam.reshape(1, -1, 1, 1) + bet.reshape(1, -1, 1, 1))

    g1 = bn(conv1x1(g, wg, bg), gam_g, bet_g)
    x1 = bn(conv1x1(x, wx), gam_x, bet_x)
    if g1.shape[2:] != x1.shape[2:]:
        g1 = jax.image.resize(
            g1, g1.shape[:2] + x1.shape[2:], method='bilinear')
    inter = jnp.maximum(g1 + x1, 0.0)
    psi = bn(conv1x1(inter, wpsi, bpsi), gam_p, bet_p)
    att = jax.nn.sigmoid(psi)
    if att.shape[2:] != x.shape[2:]:
        att = jax.image.resize(
            att, att.shape[:2] + x.shape[2:], method='bilinear')
    return att * x


def init_params(key, F_g, F_x, F_int):
    ks = jax.random.split(key, 11)
    wg = 0.1 * jax.random.normal(ks[0], (F_int, F_g), jnp.float32)
    bg = 0.1 * jax.random.normal(ks[1], (F_int,), jnp.float32)
    gam_g = 1.0 + 0.1 * jax.random.normal(ks[2], (F_int,), jnp.float32)
    bet_g = 0.05 * jax.random.normal(ks[3], (F_int,), jnp.float32)
    wx = 0.1 * jax.random.normal(ks[4], (F_int, F_x), jnp.float32)
    gam_x = 1.0 + 0.1 * jax.random.normal(ks[5], (F_int,), jnp.float32)
    bet_x = 0.05 * jax.random.normal(ks[6], (F_int,), jnp.float32)
    wpsi = 0.1 * jax.random.normal(ks[7], (1, F_int), jnp.float32)
    bpsi = 0.1 * jax.random.normal(ks[8], (1,), jnp.float32)
    gam_p = 1.0 + 0.1 * jax.random.normal(ks[9], (1,), jnp.float32)
    bet_p = 0.05 * jax.random.normal(ks[10], (1,), jnp.float32)
    return (wg, bg, gam_g, bet_g, wx, gam_x, bet_x,
            wpsi, bpsi, gam_p, bet_p)


if __name__ == "__main__":
    key = jax.random.PRNGKey(0)
    k_g, k_x, k_p = jax.random.split(key, 3)

    N, F_G, F_X, F_INT, H, W = 2, 4, 4, 8, 16, 16
    g = jax.random.normal(k_g, (N, F_G, H, W), jnp.float32)
    x = jax.random.normal(k_x, (N, F_X, H, W), jnp.float32)
    params = init_params(k_p, F_G, F_X, F_INT)

    out = jax.block_until_ready(attention_block_forward(g, x, params))
    ref = jax.block_until_ready(reference_forward(g, x, params))

    assert out.shape == (N, F_X, H, W)
    assert jnp.allclose(out, ref, rtol=1e-3, atol=1e-3), (
        float(jnp.max(jnp.abs(out - ref))))

    print("KERNEL_OK")
</pallas_src>

<mosaic_0001>
module attributes {stable_mosaic.version = 11 : i64} {
  func.func @attention_block_kernel(%arg0: i32, %arg1: memref<4x512xf32, #tpu.memory_space<vmem>>, %arg2: memref<4x512xf32, #tpu.memory_space<vmem>>, %arg3: memref<8x4xf32, #tpu.memory_space<vmem>>, %arg4: memref<8x1xf32, #tpu.memory_space<vmem>>, %arg5: memref<8x1xf32, #tpu.memory_space<vmem>>, %arg6: memref<8x4xf32, #tpu.memory_space<vmem>>, %arg7: memref<8x1xf32, #tpu.memory_space<vmem>>, %arg8: memref<8x1xf32, #tpu.memory_space<vmem>>, %arg9: memref<1x8xf32, #tpu.memory_space<vmem>>, %arg10: memref<1x1xf32, #tpu.memory_space<vmem>>, %arg11: memref<1x1xf32, #tpu.memory_space<vmem>>, %arg12: memref<4x512xf32, #tpu.memory_space<vmem>>) attributes {dimension_semantics = [#tpu.dimension_semantics<arbitrary>], iteration_bounds = array<i64: 1>, scalar_prefetch = 0 : i64, scratch_operands = 0 : i64, tpu.core_type = #tpu.core_type<tc>, window_params = [{pipeline_mode = #tpu.pipeline_mode<synchronous>, transform_indices = @transform_0, window_bounds = array<i64: 4, 512>}, {pipeline_mode = #tpu.pipeline_mode<synchronous>, transform_indices = @transform_1, window_bounds = array<i64: 4, 512>}, {pipeline_mode = #tpu.pipeline_mode<synchronous>, transform_indices = @transform_2, window_bounds = array<i64: 8, 4>}, {pipeline_mode = #tpu.pipeline_mode<synchronous>, transform_indices = @transform_3, window_bounds = array<i64: 8, 1>}, {pipeline_mode = #tpu.pipeline_mode<synchronous>, transform_indices = @transform_4, window_bounds = array<i64: 8, 1>}, {pipeline_mode = #tpu.pipeline_mode<synchronous>, transform_indices = @transform_5, window_bounds = array<i64: 8, 4>}, {pipeline_mode = #tpu.pipeline_mode<synchronous>, transform_indices = @transform_6, window_bounds = array<i64: 8, 1>}, {pipeline_mode = #tpu.pipeline_mode<synchronous>, transform_indices = @transform_7, window_bounds = array<i64: 8, 1>}, {pipeline_mode = #tpu.pipeline_mode<synchronous>, transform_indices = @transform_8, window_bounds = array<i64: 1, 8>}, {pipeline_mode = #tpu.pipeline_mode<synchronous>, transform_indices = @transform_9, window_bounds = array<i64: 1, 1>}, {pipeline_mode = #tpu.pipeline_mode<synchronous>, transform_indices = @transform_10, window_bounds = array<i64: 1, 1>}, {pipeline_mode = #tpu.pipeline_mode<synchronous>, transform_indices = @transform_11, window_bounds = array<i64: 4, 512>}]} {
    %c0 = arith.constant 0 : index
    %c0_0 = arith.constant 0 : index
    %0 = vector.load %arg1[%c0, %c0_0] : memref<4x512xf32, #tpu.memory_space<vmem>>, vector<4x512xf32>
    %c0_1 = arith.constant 0 : index
    %c0_2 = arith.constant 0 : index
    %1 = vector.load %arg2[%c0_1, %c0_2] : memref<4x512xf32, #tpu.memory_space<vmem>>, vector<4x512xf32>
    %c0_3 = arith.constant 0 : index
    %c0_4 = arith.constant 0 : index
    %2 = vector.load %arg3[%c0_3, %c0_4] : memref<8x4xf32, #tpu.memory_space<vmem>>, vector<8x4xf32>
    %cst = arith.constant dense<0.000000e+00> : vector<8x512xf32>
    %3 = tpu.matmul %2, %0, %cst {dimension_numbers = #tpu.dot_dimension_numbers<[1], [0], [0], [1], [0, 0, 1, 1], [], []>} : vector<8x4xf32>, vector<4x512xf32>, vector<8x512xf32> -> vector<8x512xf32>
    %cst_5 = arith.constant dense<0.000000e+00> : vector<8xf32>
    %4 = vector.multi_reduction <add>, %3, %cst_5 [1] : vector<8x512xf32> to vector<8xf32>
    %5 = vector.shape_cast %4 : vector<8xf32> to vector<8x1xf32>
    %cst_6 = arith.constant 5.120000e+02 : f32
    %6 = vector.broadcast %cst_6 : f32 to vector<8x1xf32>
    %7 = arith.divf %5, %6 : vector<8x1xf32>
    %8 = vector.broadcast %7 : vector<8x1xf32> to vector<8x512xf32>
    %9 = arith.subf %3, %8 : vector<8x512xf32>
    %10 = arith.mulf %9, %9 : vector<8x512xf32>
    %cst_7 = arith.constant dense<0.000000e+00> : vector<8xf32>
    %11 = vector.multi_reduction <add>, %10, %cst_7 [1] : vector<8x512xf32> to vector<8xf32>
    %12 = vector.shape_cast %11 : vector<8xf32> to vector<8x1xf32>
    %cst_8 = arith.constant 5.120000e+02 : f32
    %13 = vector.broadcast %cst_8 : f32 to vector<8x1xf32>
    %14 = arith.divf %12, %13 : vector<8x1xf32>
    %15 = vector.broadcast %7 : vector<8x1xf32> to vector<8x512xf32>
    %16 = arith.subf %3, %15 : vector<8x512xf32>
    %cst_9 = arith.constant 9.99999974E-6 : f32
    %17 = vector.broadcast %cst_9 : f32 to vector<8x1xf32>
    %18 = arith.addf %14, %17 : vector<8x1xf32>
    %19 = math.rsqrt %18 : vector<8x1xf32>
    %20 = vector.broadcast %19 : vector<8x1xf32> to vector<8x512xf32>
    %21 = arith.mulf %16, %20 : vector<8x512xf32>
    %c0_10 = arith.constant 0 : index
    %c0_11 = arith.constant 0 : index
    %22 = vector.load %arg4[%c0_10, %c0_11] : memref<8x1xf32, #tpu.memory_space<vmem>>, vector<8x1xf32>
    %23 = vector.broadcast %22 : vector<8x1xf32> to vector<8x512xf32>
    %24 = arith.mulf %21, %23 : vector<8x512xf32>
    %c0_12 = arith.constant 0 : index
    %c0_13 = arith.constant 0 : index
    %25 = vector.load %arg5[%c0_12, %c0_13] : memref<8x1xf32, #tpu.memory_space<vmem>>, vector<8x1xf32>
    %26 = vector.broadcast %25 : vector<8x1xf32> to vector<8x512xf32>
    %27 = arith.addf %24, %26 : vector<8x512xf32>
    %c0_14 = arith.constant 0 : index
    %c0_15 = arith.constant 0 : index
    %28 = vector.load %arg6[%c0_14, %c0_15] : memref<8x4xf32, #tpu.memory_space<vmem>>, vector<8x4xf32>
    %cst_16 = arith.constant dense<0.000000e+00> : vector<8x512xf32>
    %29 = tpu.matmul %28, %1, %cst_16 {dimension_numbers = #tpu.dot_dimension_numbers<[1], [0], [0], [1], [0, 0, 1, 1], [], []>} : vector<8x4xf32>, vector<4x512xf32>, vector<8x512xf32> -> vector<8x512xf32>
    %cst_17 = arith.constant dense<0.000000e+00> : vector<8xf32>
    %30 = vector.multi_reduction <add>, %29, %cst_17 [1] : vector<8x512xf32> to vector<8xf32>
    %31 = vector.shape_cast %30 : vector<8xf32> to vector<8x1xf32>
    %cst_18 = arith.constant 5.120000e+02 : f32
    %32 = vector.broadcast %cst_18 : f32 to vector<8x1xf32>
    %33 = arith.divf %31, %32 : vector<8x1xf32>
    %34 = vector.broadcast %33 : vector<8x1xf32> to vector<8x512xf32>
    %35 = arith.subf %29, %34 : vector<8x512xf32>
    %36 = arith.mulf %35, %35 : vector<8x512xf32>
    %cst_19 = arith.constant dense<0.000000e+00> : vector<8xf32>
    %37 = vector.multi_reduction <add>, %36, %cst_19 [1] : vector<8x512xf32> to vector<8xf32>
    %38 = vector.shape_cast %37 : vector<8xf32> to vector<8x1xf32>
    %cst_20 = arith.constant 5.120000e+02 : f32
    %39 = vector.broadcast %cst_20 : f32 to vector<8x1xf32>
    %40 = arith.divf %38, %39 : vector<8x1xf32>
    %41 = vector.broadcast %33 : vector<8x1xf32> to vector<8x512xf32>
    %42 = arith.subf %29, %41 : vector<8x512xf32>
    %cst_21 = arith.constant 9.99999974E-6 : f32
    %43 = vector.broadcast %cst_21 : f32 to vector<8x1xf32>
    %44 = arith.addf %40, %43 : vector<8x1xf32>
    %45 = math.rsqrt %44 : vector<8x1xf32>
    %46 = vector.broadcast %45 : vector<8x1xf32> to vector<8x512xf32>
    %47 = arith.mulf %42, %46 : vector<8x512xf32>
    %c0_22 = arith.constant 0 : index
    %c0_23 = arith.constant 0 : index
    %48 = vector.load %arg7[%c0_22, %c0_23] : memref<8x1xf32, #tpu.memory_space<vmem>>, vector<8x1xf32>
    %49 = vector.broadcast %48 : vector<8x1xf32> to vector<8x512xf32>
    %50 = arith.mulf %47, %49 : vector<8x512xf32>
    %c0_24 = arith.constant 0 : index
    %c0_25 = arith.constant 0 : index
    %51 = vector.load %arg8[%c0_24, %c0_25] : memref<8x1xf32, #tpu.memory_space<vmem>>, vector<8x1xf32>
    %52 = vector.broadcast %51 : vector<8x1xf32> to vector<8x512xf32>
    %53 = arith.addf %50, %52 : vector<8x512xf32>
    %54 = arith.addf %27, %53 : vector<8x512xf32>
    %cst_26 = arith.constant 0.000000e+00 : f32
    %55 = vector.broadcast %cst_26 : f32 to vector<8x512xf32>
    %56 = arith.maximumf %54, %55 : vector<8x512xf32>
    %c0_27 = arith.constant 0 : index
    %c0_28 = arith.constant 0 : index
    %57 = vector.load %arg9[%c0_27, %c0_28] : memref<1x8xf32, #tpu.memory_space<vmem>>, vector<1x8xf32>
    %cst_29 = arith.constant dense<0.000000e+00> : vector<1x512xf32>
    %58 = tpu.matmul %57, %56, %cst_29 {dimension_numbers = #tpu.dot_dimension_numbers<[1], [0], [0], [1], [0, 0, 1, 1], [], []>} : vector<1x8xf32>, vector<8x512xf32>, vector<1x512xf32> -> vector<1x512xf32>
    %cst_30 = arith.constant dense<0.000000e+00> : vector<1xf32>
    %59 = vector.multi_reduction <add>, %58, %cst_30 [1] : vector<1x512xf32> to vector<1xf32>
    %60 = vector.shape_cast %59 : vector<1xf32> to vector<1x1xf32>
    %cst_31 = arith.constant 5.120000e+02 : f32
    %61 = vector.broadcast %cst_31 : f32 to vector<1x1xf32>
    %62 = arith.divf %60, %61 : vector<1x1xf32>
    %63 = vector.broadcast %62 : vector<1x1xf32> to vector<1x512xf32>
    %64 = arith.subf %58, %63 : vector<1x512xf32>
    %65 = arith.mulf %64, %64 : vector<1x512xf32>
    %cst_32 = arith.constant dense<0.000000e+00> : vector<1xf32>
    %66 = vector.multi_reduction <add>, %65, %cst_32 [1] : vector<1x512xf32> to vector<1xf32>
    %67 = vector.shape_cast %66 : vector<1xf32> to vector<1x1xf32>
    %cst_33 = arith.constant 5.120000e+02 : f32
    %68 = vector.broadcast %cst_33 : f32 to vector<1x1xf32>
    %69 = arith.divf %67, %68 : vector<1x1xf32>
    %70 = vector.broadcast %62 : vector<1x1xf32> to vector<1x512xf32>
    %71 = arith.subf %58, %70 : vector<1x512xf32>
    %cst_34 = arith.constant 9.99999974E-6 : f32
    %72 = vector.broadcast %cst_34 : f32 to vector<1x1xf32>
    %73 = arith.addf %69, %72 : vector<1x1xf32>
    %74 = math.rsqrt %73 : vector<1x1xf32>
    %75 = vector.broadcast %74 : vector<1x1xf32> to vector<1x512xf32>
    %76 = arith.mulf %71, %75 : vector<1x512xf32>
    %c0_35 = arith.constant 0 : index
    %c0_36 = arith.constant 0 : index
    %77 = vector.load %arg10[%c0_35, %c0_36] : memref<1x1xf32, #tpu.memory_space<vmem>>, vector<1x1xf32>
    %78 = vector.broadcast %77 : vector<1x1xf32> to vector<1x512xf32>
    %79 = arith.mulf %76, %78 : vector<1x512xf32>
    %c0_37 = arith.constant 0 : index
    %c0_38 = arith.constant 0 : index
    %80 = vector.load %arg11[%c0_37, %c0_38] : memref<1x1xf32, #tpu.memory_space<vmem>>, vector<1x1xf32>
    %81 = vector.broadcast %80 : vector<1x1xf32> to vector<1x512xf32>
    %82 = arith.addf %79, %81 : vector<1x512xf32>
    %cst_39 = arith.constant 0.000000e+00 : f32
    %83 = vector.broadcast %cst_39 : f32 to vector<1x512xf32>
    %84 = arith.subf %83, %82 : vector<1x512xf32>
    %85 = math.exp %84 : vector<1x512xf32>
    %cst_40 = arith.constant 1.000000e+00 : f32
    %86 = vector.broadcast %cst_40 : f32 to vector<1x512xf32>
    %87 = arith.addf %86, %85 : vector<1x512xf32>
    %cst_41 = arith.constant 1.000000e+00 : f32
    %88 = vector.broadcast %cst_41 : f32 to vector<1x512xf32>
    %89 = arith.divf %88, %87 : vector<1x512xf32>
    %90 = vector.broadcast %89 : vector<1x512xf32> to vector<4x512xf32>
    %91 = arith.mulf %90, %1 : vector<4x512xf32>
    %c0_42 = arith.constant 0 : index
    %c0_43 = arith.constant 0 : index
    %92 = vector.load %arg12[%c0_42, %c0_43] : memref<4x512xf32, #tpu.memory_space<vmem>>, vector<4x512xf32>
    tpu.vector_store %arg12[%c0_42, %c0_43], %91 {strides = array<i32>} : memref<4x512xf32, #tpu.memory_space<vmem>>, vector<4x512xf32>,
    return
  }
  func.func @transform_0(%arg0: i32) -> (i32, i32) {
    %c0_i32 = arith.constant 0 : i32
    %c0_i32_0 = arith.constant 0 : i32
    %c0_i32_1 = arith.constant 0 : i32
    return %c0_i32, %c0_i32_0 : i32, i32
  }
  func.func @transform_1(%arg0: i32) -> (i32, i32) {
    %c0_i32 = arith.constant 0 : i32
    %c0_i32_0 = arith.constant 0 : i32
    %c0_i32_1 = arith.constant 0 : i32
    return %c0_i32, %c0_i32_0 : i32, i32
  }
  func.func @transform_2(%arg0: i32) -> (i32, i32) {
    %c0_i32 = arith.constant 0 : i32
    %c0_i32_0 = arith.constant 0 : i32
    %c0_i32_1 = arith.constant 0 : i32
    return %c0_i32, %c0_i32_0 : i32, i32
  }
  func.func @transform_3(%arg0: i32) -> (i32, i32) {
    %c0_i32 = arith.constant 0 : i32
    %c0_i32_0 = arith.constant 0 : i32
    %c0_i32_1 = arith.constant 0 : i32
    return %c0_i32, %c0_i32_0 : i32, i32
  }
  func.func @transform_4(%arg0: i32) -> (i32, i32) {
    %c0_i32 = arith.constant 0 : i32
    %c0_i32_0 = arith.constant 0 : i32
    %c0_i32_1 = arith.constant 0 : i32
    return %c0_i32, %c0_i32_0 : i32, i32
  }
  func.func @transform_5(%arg0: i32) -> (i32, i32) {
    %c0_i32 = arith.constant 0 : i32
    %c0_i32_0 = arith.constant 0 : i32
    %c0_i32_1 = arith.constant 0 : i32
    return %c0_i32, %c0_i32_0 : i32, i32
  }
  func.func @transform_6(%arg0: i32) -> (i32, i32) {
    %c0_i32 = arith.constant 0 : i32
    %c0_i32_0 = arith.constant 0 : i32
    %c0_i32_1 = arith.constant 0 : i32
    return %c0_i32, %c0_i32_0 : i32, i32
  }
  func.func @transform_7(%arg0: i32) -> (i32, i32) {
    %c0_i32 = arith.constant 0 : i32
    %c0_i32_0 = arith.constant 0 : i32
    %c0_i32_1 = arith.constant 0 : i32
    return %c0_i32, %c0_i32_0 : i32, i32
  }
  func.func @transform_8(%arg0: i32) -> (i32, i32) {
    %c0_i32 = arith.constant 0 : i32
    %c0_i32_0 = arith.constant 0 : i32
    %c0_i32_1 = arith.constant 0 : i32
    return %c0_i32, %c0_i32_0 : i32, i32
  }
  func.func @transform_9(%arg0: i32) -> (i32, i32) {
    %c0_i32 = arith.constant 0 : i32
    %c0_i32_0 = arith.constant 0 : i32
    %c0_i32_1 = arith.constant 0 : i32
    return %c0_i32, %c0_i32_0 : i32, i32
  }
  func.func @transform_10(%arg0: i32) -> (i32, i32) {
    %c0_i32 = arith.constant 0 : i32
    %c0_i32_0 = arith.constant 0 : i32
    %c0_i32_1 = arith.constant 0 : i32
    return %c0_i32, %c0_i32_0 : i32, i32
  }
  func.func @transform_11(%arg0: i32) -> (i32, i32) {
    %c0_i32 = arith.constant 0 : i32
    %c0_i32_0 = arith.constant 0 : i32
    %c0_i32_1 = arith.constant 0 : i32
    return %c0_i32, %c0_i32_0 : i32, i32
  }
}

</mosaic_0001>

<bundles_post_ra>
// kernel: tpu_custom_call.1
= control target key start
LH: loop header
LB: loop body
LE: loop exit
PB: predicated region body
PF: predicated region fallthrough
CT: control target
= control target key end

     0   :  { %s969_s0 = inlined_call_operand.vmem [shape: f32[4,512], index: 0, kind: input, shape index: {}]   ;;  %s970_s1 = inlined_call_operand.vmem [shape: f32[4,512], index: 1, kind: input, shape index: {}]   ;;  %s971_s2 = inlined_call_operand.vmem [shape: f32[8,4], index: 2, kind: input, shape index: {}]   ;;  %s972_s3 = inlined_call_operand.vmem [shape: f32[8,1], index: 3, kind: input, shape index: {}]   ;;  %s973_s4 = inlined_call_operand.vmem [shape: f32[8,1], index: 4, kind: input, shape index: {}]   ;;  %s974_s5 = inlined_call_operand.vmem [shape: f32[8,4], index: 5, kind: input, shape index: {}]   ;;  %s975_s6 = inlined_call_operand.vmem [shape: f32[8,1], index: 6, kind: input, shape index: {}]   ;;  %s976_s7 = inlined_call_operand.vmem [shape: f32[8,1], index: 7, kind: input, shape index: {}]   ;;  %s977_s8 = inlined_call_operand.vmem [shape: f32[1,8], index: 8, kind: input, shape index: {}]   ;;  %s978_s9 = inlined_call_operand.<no memory space> [shape: f32[1,1], index: 9, kind: input, shape index: {}]   ;;  %s979_s11 = inlined_call_operand.hbm [shape: f32[4,512], index: 11, kind: output, shape index: {}]   ;;  %s980_s10 = inlined_call_operand.<no memory space> [shape: f32[1,1], index: 10, kind: input, shape index: {}]  }
   0x1   :  { %v16_v0 = vstv %s978_s9  ;;  %v18_v1 = vstv %s980_s10 }
   0x2   :  { %17 = vst [vmem:[#allocation2] sm:$0x1] %v16_v0  ;;  %19 = vst [vmem:[#allocation3] sm:$0x1] %v18_v1 }
   0x3   :  { %v43_v2 = vld [vmem:[%s969_s0] sm:$0xff]  ;;  %vm56_vm0 = vcmask 1043456   ;;  %v44_v3 = vld [vmem:[%s969_s0 + $0x8] sm:$0xff]  ;;  %v815_v5 = vmov 0.0   ;;  %vm52_vm1 = vcmask 31744  }
   0x4   :  { %v50_v4 = vcombine.high %v43_v2, %v43_v2  ;;  %129 = vmatprep.mubr.f32.mxu0 %v815_v5  ;;  %v51_v6 = vcombine.high %v44_v3, %v44_v3  ;;  %200 = vmatprep.mubr.f32.mxu1 %v815_v5  ;;  %v893_v7 = vld [vmem:[%s970_s1] sm:$0xff]  ;;  %v898_v8 = vld [vmem:[%s970_s1 + $0x8] sm:$0xff] }
   0x5   :  { %v47_v9 = vld [vmem:[%s971_s2] sm:$0xff]  ;;  %v905_v10 = vcombine.high %v893_v7, %v893_v7 }
   0x6   :  { %20 = vsyncpa [#allocation5], 0  ;;  %746 = vmatprep.subr.msk.mxu0 %vm56_vm0, %v50_v4  ;;  %749 = vmatprep.subr.msk.mxu1 %vm56_vm0, %v51_v6  ;;  %v911_v11 = vcombine.high %v898_v8, %v898_v8  ;;  %v254_v12 = vld [vmem:[%s974_s5] sm:$0xff]  ;;  %v816_v14 = vmov 0   ;;  %vm467_vm2 = vcmask 64512   ;;  %vm613_vm3 = vcmask 1040384  }
   0x7   :  { %747 = vmatpush1.msk.msra.mxu0 %vm56_vm0, %v43_v2  ;;  %750 = vmatpush1.msk.msra.mxu1 %vm56_vm0, %v44_v3  ;;  %v438_v13 = vld [vmem:[%s975_s6] sm:$0xff] }
   0x8   :  { %748 = vmatmul.mubr.msk.f32.vlgmr.msra.gmra.mrb[0].mxu0 %vm52_vm1, %v47_v9  ;;  %751 = vmatmul.mubr.msk.f32.vlgmr.msra.gmra.mrb[0].mxu1 %vm52_vm1, %v47_v9  ;;  %v244_v15 = vld [vmem:[%s973_s4] sm:$0xff] }
   0x9   :  { %752 = vmatprep.subr.msk.mxu0 %vm56_vm0, %v905_v10  ;;  %334 = vmatprep.mubr.f32.mxu0 %v815_v5  ;;  %v234_v30 = vld [vmem:[%s972_s3] sm:$0xff] }
   0xa   :  { %753 = vmatpush1.msk.msra.mxu0 %vm56_vm0, %v893_v7  ;;  %755 = vmatprep.subr.msk.mxu1 %vm56_vm0, %v911_v11  ;;  %v448_v57 = vld [vmem:[%s976_s7] sm:$0xff] }
   0xb   :  { %756 = vmatpush1.msk.msra.mxu1 %vm56_vm0, %v898_v8  ;;  %405 = vmatprep.mubr.f32.mxu1 %v815_v5 }
   0xc   :  { %754 = vmatmul.mubr.msk.f32.vlgmr.msra.gmra.mrb[2].mxu0 %vm52_vm1, %v254_v12  ;;  %757 = vmatmul.mubr.msk.f32.vlgmr.msra.gmra.mrb[2].mxu1 %vm52_vm1, %v254_v12 }
   0xd   :  { %535 = vmatprep.mubr.f32.mxu0 %v815_v5  ;;  %606 = vmatprep.mubr.f32.mxu1 %v815_v5 }
   0xe   :  { %764 = vset.pattern.permute.xlu1 %v816_v14  ;;  %763 = vset.pattern.permute.xlu0 %v816_v14 }
   0xf   :  { %441 = vperm.xlu1 %764, %v438_v13  }
  0x13   :  { %247 = vperm.xlu1 %764, %v244_v15  }
  0x8e   :  { %v442_v58 = vpop.permute.xlu1 %441 }
  0x92   :  { %v248_v59 = vpop.permute.xlu1 %247 }
  0xdb   :  { %v131_v16 = vpop.f32.mrb[0].mxu0  ;;  %v202_v17 = vpop.f32.mrb[0].mxu1 }
  0xdc   :  { %v133_v18 = vpop.f32.mrb[1].mxu0  ;;  %v204_v19 = vpop.f32.mrb[1].mxu1 }
  0xdd   :  { %v207_v20 = vadd.f32 %v133_v18, %v131_v16 }
  0xdf   :  { %v208_v21 = vadd.f32 %v207_v20, %v202_v17  ;;  %v336_v22 = vpop.f32.mrb[2].mxu0  ;;  %v407_v23 = vpop.f32.mrb[2].mxu1 }
  0xe0   :  { %v338_v24 = vpop.f32.mrb[3].mxu0  ;;  %v409_v25 = vpop.f32.mrb[3].mxu1 }
  0xe1   :  { %v412_v26 = vadd.f32 %v338_v24, %v336_v22  ;;  %v209_v27 = vadd.f32 %v208_v21, %v204_v19 }
  0xe3   :  { %v413_v28 = vadd.f32 %v412_v26, %v407_v23  ;;  %210 = vadd.xlane.f32.xlu0 %v209_v27 }
  0xe5   :  { %v414_v29 = vadd.f32 %v413_v28, %v409_v25 }
  0xe7   :  { %415 = vadd.xlane.f32.xlu0 %v414_v29 }
  0xfd   :  { %237 = vperm.xlu0 %763, %v234_v30  }
 0x170   :  { %v211_v31 = vpop.xlane.xlu0 %210 }
 0x171   :  { %v213_v32 = vmul.f32 0.001953125, %v211_v31 }
 0x173   :  { %v214_v33 = vsub.f32 %v131_v16, %v213_v32  ;;  %v215_v34 = vsub.f32 %v133_v18, %v213_v32  ;;  %v216_v35 = vsub.f32 %v202_v17, %v213_v32  ;;  %v217_v37 = vsub.f32 %v204_v19, %v213_v32 }
 0x174   :  { %v416_v36 = vpop.xlane.xlu0 %415 }
 0x175   :  { %v417_v38 = vmul.f32 0.001953125, %v416_v36  ;;  %v218_v39 = vmul.f32 %v214_v33, %v214_v33  ;;  %v219_v40 = vmul.f32 %v215_v34, %v215_v34  ;;  %v220_v41 = vmul.f32 %v216_v35, %v216_v35 }
 0x176   :  { %v221_v46 = vmul.f32 %v217_v37, %v217_v37 }
 0x177   :  { %v418_v42 = vsub.f32 %v336_v22, %v417_v38  ;;  %v419_v43 = vsub.f32 %v338_v24, %v417_v38  ;;  %v222_v44 = vadd.f32 %v219_v40, %v218_v39  ;;  %v420_v45 = vsub.f32 %v407_v23, %v417_v38 }
 0x178   :  { %v421_v48 = vsub.f32 %v409_v25, %v417_v38 }
 0x179   :  { %v223_v47 = vadd.f32 %v222_v44, %v220_v41  ;;  %v422_v49 = vmul.f32 %v418_v42, %v418_v42  ;;  %v423_v50 = vmul.f32 %v419_v43, %v419_v43  ;;  %v424_v52 = vmul.f32 %v420_v45, %v420_v45 }
 0x17a   :  { %v425_v54 = vmul.f32 %v421_v48, %v421_v48 }
 0x17b   :  { %v224_v51 = vadd.f32 %v223_v47, %v221_v46  ;;  %v426_v53 = vadd.f32 %v423_v50, %v422_v49 }
 0x17c   :  { %v238_v9 = vpop.permute.xlu0 %237 }
 0x17d   :  { %225 = vadd.xlane.f32.xlu1 %v224_v51  ;;  %v427_v55 = vadd.f32 %v426_v53, %v424_v52 }
 0x17f   :  { %v428_v56 = vadd.f32 %v427_v55, %v425_v54  ;;  %v648_v54 = vld [vmem:[#allocation2] sm:$0x1] }
 0x181   :  { %429 = vadd.xlane.f32.xlu1 %v428_v56 }
 0x192   :  { %451 = vperm.xlu1 %764, %v448_v57  }
 0x20a   :  { %v226_v60 = vpop.xlane.xlu1 %225 }
 0x20b   :  { %v227_v61 = vmul.f32 0.001953125, %v226_v60 }
 0x20d   :  { %v228_v62 = vadd.f32 1e-05, %v227_v61 }
 0x20e   :  { %v430_v63 = vpop.xlane.xlu1 %429 }
 0x20f   :  { %769 = vrsqrt.f32 %v228_v62  ;;  %v431_v0 = vmul.f32 0.001953125, %v430_v63 }
 0x211   :  { %v432_v1 = vadd.f32 1e-05, %v431_v0 }
 0x212   :  { %v452_v25 = vpop.permute.xlu1 %451 }
 0x213   :  { %771 = vrsqrt.f32 %v432_v1 }
 0x219   :  { %v770_v2 = vpop.eup %769 }
 0x21a   :  { %v230_v3 = vmul.f32 %v770_v2, %v214_v33  ;;  %v231_v4 = vmul.f32 %v770_v2, %v215_v34  ;;  %v232_v5 = vmul.f32 %v770_v2, %v216_v35  ;;  %v233_v6 = vmul.f32 %v770_v2, %v217_v37 }
 0x21c   :  { %v240_v13 = vmul.f32 %v238_v9, %v230_v3  ;;  %v241_v14 = vmul.f32 %v238_v9, %v231_v4  ;;  %v242_v15 = vmul.f32 %v238_v9, %v232_v5  ;;  %v243_v16 = vmul.f32 %v238_v9, %v233_v6 }
 0x21d   :  { %v772_v12 = vpop.eup %771 }
 0x21e   :  { %v434_v17 = vmul.f32 %v772_v12, %v418_v42  ;;  %v435_v18 = vmul.f32 %v772_v12, %v419_v43  ;;  %v436_v19 = vmul.f32 %v772_v12, %v420_v45  ;;  %v437_v20 = vmul.f32 %v772_v12, %v421_v48  ;;  %v466_v42 = vld [vmem:[%s977_s8] sm:$0x1]  ;;  %v662_v12 = vld [vmem:[#allocation3] sm:$0x1]  ;;  %s817_s8 = smov [#allocation4]  }
 0x21f   :  { %v250_v26 = vadd.f32 %v248_v59, %v240_v13  ;;  %v252_v27 = vadd.f32 %v248_v59, %v242_v15  ;;  %v251_v28 = vadd.f32 %v248_v59, %v241_v14  ;;  %v253_v29 = vadd.f32 %v248_v59, %v243_v16  ;;  %s738_s14 = sshll.u32 %s817_s8, 4  ;;  %s739_s14 = int_to_ptr.vmem [resolvable:$true] %s738_s14 }
 0x220   :  { %v444_v21 = vmul.f32 %v442_v58, %v434_v17  ;;  %v445_v22 = vmul.f32 %v442_v58, %v435_v18  ;;  %v446_v23 = vmul.f32 %v442_v58, %v436_v19  ;;  %v447_v24 = vmul.f32 %v442_v58, %v437_v20  ;;  %s791_s15 = scalar_lea.vmem %s739_s14, 256  ;;  %p796_p1 = scmp.lt.s32.totalorder %s739_s14, %s739_s14 }
 0x221   :  { %v654_v15 = vlaneseq  ;;  %p792_p0 = scmp.ne.s32.totalorder %s739_s14, %s791_s15  ;;  %p797_p2 = scmp.lt.s32.totalorder %s791_s15, %s791_s15 }
 0x222   :  { %v454_v30 = vadd.f32 %v452_v25, %v444_v21  ;;  %v455_v31 = vadd.f32 %v452_v25, %v445_v22  ;;  %v456_v32 = vadd.f32 %v452_v25, %v446_v23  ;;  %v457_v33 = vadd.f32 %v452_v25, %v447_v24 }
 0x223   :  { %v655_v17 = vshrl.u32 %v654_v15, 7  ;;  %p798_p3 = por %p797_p2, %p796_p1 }
 0x224   :  { %v459_v34 = vadd.f32 %v455_v31, %v251_v28  ;;  %v461_v35 = vadd.f32 %v457_v33, %v253_v29  ;;  %v458_v36 = vadd.f32 %v454_v30, %v250_v26  ;;  %v460_v37 = vadd.f32 %v456_v32, %v252_v27 }
 0x225   :  { %v656_v18 = vsub.s32 0, %v655_v17  ;;  %p799_p4 = pnand %p798_p3, %p792_p0 }
 0x226   :  { %v463_v38 = vmax.f32 %v459_v34, 0.0  ;;  %v465_v39 = vmax.f32 %v461_v35, 0.0  ;;  %v462_v40 = vmax.f32 %v458_v36, 0.0  ;;  %v464_v41 = vmax.f32 %v460_v37, 0.0 }
 0x228   :  { %471 = vmatprep.subr.mxu0 %v463_v38  ;;  %542 = vmatprep.subr.mxu1 %v465_v39 }
 0x229   :  { %472 = vmatpush1.msra.mxu0 %v462_v40  ;;  %543 = vmatpush1.msra.mxu1 %v464_v41 }
 0x22a   :  { %758 = vmatmul.mubr.msk.f32.vlgmr.msra.gmra.mrb[4].mxu0 %vm467_vm2, %v466_v42  ;;  %759 = vmatmul.mubr.msk.f32.vlgmr.msra.gmra.mrb[4].mxu1 %vm467_vm2, %v466_v42 }
 0x2fd   :  { %v537_v43 = vpop.f32.mrb[4].mxu0  ;;  %v608_v44 = vpop.f32.mrb[4].mxu1 }
 0x2fe   :  { %v614_v45 = vsel %vm613_vm3, %v537_v43, 0.0  ;;  %v539_v46 = vpop.f32.mrb[5].mxu0  ;;  %v610_v47 = vpop.f32.mrb[5].mxu1  ;;  %v617_v49 = vsel %vm613_vm3, %v608_v44, 0.0 }
 0x2ff   :  { %v615_v48 = vsel %vm613_vm3, %v539_v46, 0.0  ;;  %v619_v52 = vsel %vm613_vm3, %v610_v47, 0.0 }
 0x300   :  { %v616_v50 = vadd.f32 %v615_v48, %v614_v45 }
 0x302   :  { %v618_v51 = vadd.f32 %v617_v49, %v616_v50 }
 0x304   :  { %v620_v53 = vadd.f32 %v619_v52, %v618_v51 }
 0x306   :  { %621 = vadd.xlane.f32.xlu1 %v620_v53 }
 0x317   :  { %651 = vperm.xlu1 %764, %v648_v54  }
 0x393   :  { %v622_v55 = vpop.xlane.xlu1 %621 }
 0x394   :  { %v623_v56 = vmul.f32 0.001953125, %v622_v55 }
 0x396   :  { %v624_v57 = vsub.f32 %v537_v43, %v623_v56  ;;  %v625_v58 = vsub.f32 %v539_v46, %v623_v56  ;;  %v626_v59 = vsub.f32 %v608_v44, %v623_v56  ;;  %v627_v60 = vsub.f32 %v610_v47, %v623_v56 }
 0x397   :  { %v652_v19 = vpop.permute.xlu1 %651 }
 0x398   :  { %v628_v61 = vmul.f32 %v624_v57, %v624_v57  ;;  %v629_v62 = vmul.f32 %v625_v58, %v625_v58  ;;  %v630_v63 = vmul.f32 %v626_v59, %v626_v59  ;;  %v631_v0 = vmul.f32 %v627_v60, %v627_v60 }
 0x399   :  { %v657_v22 = vrot.slane %v652_v19, %v656_v18 }
 0x39a   :  { %v632_v1 = vsel %vm613_vm3, %v628_v61, 0.0  ;;  %v633_v2 = vsel %vm613_vm3, %v629_v62, 0.0  ;;  %v635_v4 = vsel %vm613_vm3, %v630_v63, 0.0  ;;  %v637_v6 = vsel %vm613_vm3, %v631_v0, 0.0 }
 0x39b   :  { %v634_v3 = vadd.f32 %v633_v2, %v632_v1 }
 0x39d   :  { %v636_v5 = vadd.f32 %v635_v4, %v634_v3 }
 0x39f   :  { %v638_v9 = vadd.f32 %v637_v6, %v636_v5 }
 0x3a1   :  { %639 = vadd.xlane.f32.xlu0 %v638_v9 }
 0x3b7   :  { %665 = vperm.xlu0 %763, %v662_v12  }
 0x42e   :  { %v640_v13 = vpop.xlane.xlu0 %639 }
 0x42f   :  { %v641_v14 = vmul.f32 0.001953125, %v640_v13 }
 0x431   :  { %v642_v16 = vadd.f32 1e-05, %v641_v14 }
 0x433   :  { %773 = vrsqrt.f32 %v642_v16 }
 0x436   :  { %v666_v20 = vpop.permute.xlu0 %665 }
 0x437   :  { %v671_v27 = vrot.slane %v666_v20, %v656_v18 }
 0x43d   :  { %v774_v21 = vpop.eup %773 }
 0x43e   :  { %v644_v23 = vmul.f32 %v774_v21, %v624_v57  ;;  %v645_v24 = vmul.f32 %v774_v21, %v625_v58  ;;  %v646_v25 = vmul.f32 %v774_v21, %v626_v59  ;;  %v647_v26 = vmul.f32 %v774_v21, %v627_v60 }
 0x440   :  { %v658_v28 = vmul.f32 %v657_v22, %v644_v23  ;;  %v659_v29 = vmul.f32 %v657_v22, %v645_v24  ;;  %v660_v30 = vmul.f32 %v657_v22, %v646_v25  ;;  %v661_v31 = vmul.f32 %v657_v22, %v647_v26 }
 0x442   :  { %v672_v32 = vadd.f32 %v671_v27, %v658_v28  ;;  %v673_v33 = vadd.f32 %v671_v27, %v659_v29  ;;  %v674_v34 = vadd.f32 %v671_v27, %v660_v30  ;;  %v675_v35 = vadd.f32 %v671_v27, %v661_v31 }
 0x444   :  { %v676_v36 = vsub.f32 0.0, %v672_v32  ;;  %v677_v37 = vsub.f32 0.0, %v673_v33  ;;  %v678_v38 = vsub.f32 0.0, %v674_v34  ;;  %v679_v39 = vsub.f32 0.0, %v675_v35 }
 0x446   :  { %v680_v40 = vmul.f32 1.442695, %v676_v36  ;;  %v682_v41 = vmul.f32 1.442695, %v677_v37  ;;  %v684_v42 = vmul.f32 1.442695, %v678_v38 }
 0x447   :  { %v686_v43 = vmul.f32 1.442695, %v679_v39 }
 0x448   :  { %775 = vpow2.f32 %v680_v40 }
 0x449   :  { %777 = vpow2.f32 %v682_v41 }
 0x44a   :  { %779 = vpow2.f32 %v684_v42 }
 0x44b   :  { %781 = vpow2.f32 %v686_v43 }
 0x452   :  { %v776_v44 = vpop.eup %775 }
 0x453   :  { %v778_v45 = vpop.eup %777  ;;  %v688_v46 = vadd.f32 1.0, %v776_v44 }
 0x454   :  { %v780_v47 = vpop.eup %779  ;;  %v689_v48 = vadd.f32 1.0, %v778_v45 }
 0x455   :  { %v782_v49 = vpop.eup %781  ;;  %v690_v50 = vadd.f32 1.0, %v780_v47  ;;  %783 = vrcp.f32 %v688_v46 }
 0x456   :  { %v691_v51 = vadd.f32 1.0, %v782_v49  ;;  %785 = vrcp.f32 %v689_v48 }
 0x457   :  { %787 = vrcp.f32 %v690_v50 }
 0x458   :  { %789 = vrcp.f32 %v691_v51 }
 0x45f   :  { %v784_v52 = vpop.eup %783 }
 0x460   :  { %v786_v53 = vpop.eup %785  ;;  %v703_v54 = vrot.slane %v784_v52, %v656_v18 }
 0x461   :  { %v788_v55 = vpop.eup %787  ;;  %v707_v56 = vrot.slane %v786_v53, %v656_v18 }
 0x462   :  { %v790_v57 = vpop.eup %789  ;;  %v711_v58 = vrot.slane %v788_v55, %v656_v18  ;;  %v718_v59 = vmul.f32 %v703_v54, %v893_v7 }
 0x463   :  { %v715_v60 = vrot.slane %v790_v57, %v656_v18  ;;  %v719_v61 = vmul.f32 %v707_v56, %v905_v10 }
 0x464   :  { %v720_v62 = vmul.f32 %v711_v58, %v898_v8 }
 0x465   :  { %v721_v63 = vmul.f32 %v715_v60, %v911_v11  ;;  %v726_v0 = vcombine.low %v718_v59, %v719_v61 }
 0x467   :  { %v727_v1 = vcombine.low %v720_v62, %v721_v63  ;;  %730 = vst [vmem:[#allocation4] sm:$0xff] %v726_v0 }
 0x469   :  { %731 = vst [vmem:[#allocation4 + $0x8] sm:$0xff] %v727_v1 }
 0x46a   :  { %802 = shalt.err (!%p799_p4)
}
 0x46b   :  { %s803_s18 = scalar_lea.hbm %s979_s11, 256 }
 0x46c   :  { %p804_p5 = scmp.ne.s32.totalorder %s979_s11, %s803_s18  ;;  %p807_p6 = scmp.lt.u32.totalorder %s803_s18, %s979_s11 }
 0x46e   :  { %p809_p7 = pnand %p807_p6, %p804_p5 }
 0x470   :  { %812 = shalt.err (!%p809_p7)
}
 0x471   :  { %741 = dma.vmem_to_hbm [thread:$0]  %s739_s14, 256, %s979_s11, [#allocation5]  }
 0x472   :  { %813 = dma.done.wait [#allocation5], 256  }
 0x473   :  { %814 = vsyncadd [#allocation5], 4294967040 }
 0x474   :  { %745 = vsyncpa [#allocation5], 1 }

</bundles_post_ra>
